<compile_context>
chip_gen: v7x
topology: tpu7x:2x2x1
jax: 0.10.0
libtpu: 0.0.40
codegen_flags: <defaults>
</compile_context>

<pallas_src>
import jax
import jax.numpy as jnp
from jax import lax
from jax.experimental import pallas as pl
from jax.experimental.pallas import tpu as pltpu


# ----------------------------- Pallas kernels ------------------------------


def _gn_stats_kernel(x_ref, sum_ref, sqsum_ref):
    """Accumulate per-(batch, channel) sum and sum-of-squares over spatial tiles.

    x_ref:     (1, C, T)  current spatial tile (channels on sublanes, space on lanes)
    sum_ref:   (1, C, 1)  accumulator, resident across the spatial-tile grid axis
    sqsum_ref: (1, C, 1)  accumulator, resident across the spatial-tile grid axis
    """
    t = pl.program_id(1)

    @pl.when(t == 0)
    def _():
        sum_ref[...] = jnp.zeros_like(sum_ref)
        sqsum_ref[...] = jnp.zeros_like(sqsum_ref)

    x = x_ref[0]                                                  # (C, T) f32
    sum_ref[0] = sum_ref[0] + jnp.sum(x, axis=-1, keepdims=True)
    sqsum_ref[0] = sqsum_ref[0] + jnp.sum(x * x, axis=-1, keepdims=True)


def _gn_apply_kernel(x_ref, scale_ref, shift_ref, o_ref):
    """y = x * scale + shift, scale/shift per (batch, channel).

    scale/shift already fold in the group mean, rsqrt(var + eps) and gamma/beta, so this
    pass is a pure lane-dense elementwise affine over (C, T) tiles.
    """
    o_ref[0] = x_ref[0] * scale_ref[0] + shift_ref[0]


# ----------------------------- JAX wrapper ---------------------------------


def _pick_spatial_tile(hw, c, target_block_bytes=2 << 20):
    """Largest 128-multiple divisor of `hw` whose f32 (c, tile) block fits the budget."""
    if hw % 128 != 0:
        # Full spatial extent is always a legal block size (fallback for odd shapes).
        return hw
    best = 128
    t = 128
    while t <= hw:
        if hw % t == 0 and c * t * 4 <= target_block_bytes:
            best = t
        t += 128
    return best


def group_norm(x_nchw, weight, bias, num_groups, eps=1e-5, block_hw=None):
    """GroupNorm forward matching the reference PyTorch module.

    x_nchw: (B, C, H, W); weight/bias: (C,) or None (affine=False).
    """
    B, C, H, W = x_nchw.shape
    assert C % num_groups == 0
    cpg = C // num_groups
    HW = H * W

    x = x_nchw.reshape(B, C, HW).astype(jnp.float32)

    T = block_hw if block_hw is not None else _pick_spatial_tile(HW, C)
    assert HW % T == 0 and (T % 128 == 0 or T == HW), (HW, T)
    n_t = HW // T

    # ---- Pass 1: per-(batch, channel) sum / sum-of-squares, spatially tiled & pipelined.
    ch_sum, ch_sq = pl.pallas_call(
        _gn_stats_kernel,
        out_shape=(
            jax.ShapeDtypeStruct((B, C, 1), jnp.float32),
            jax.ShapeDtypeStruct((B, C, 1), jnp.float32),
        ),
        grid=(B, n_t),
        in_specs=[pl.BlockSpec((1, C, T), lambda b, t: (b, 0, t))],
        out_specs=(
            pl.BlockSpec((1, C, 1), lambda b, t: (b, 0, 0)),
            pl.BlockSpec((1, C, 1), lambda b, t: (b, 0, 0)),
        ),
        compiler_params=pltpu.CompilerParams(
            dimension_semantics=("parallel", "arbitrary")),
    )(x)

    # ---- Tiny O(B*C) finalize in plain JAX: segmented group reduction (no (C, C)
    # membership matrix, no M=1 MXU matmuls), biased variance, fold in gamma/beta.
    n = float(cpg * HW)
    g_sum = ch_sum.reshape(B, num_groups, cpg).sum(axis=-1)       # (B, G)
    g_sq = ch_sq.reshape(B, num_groups, cpg).sum(axis=-1)         # (B, G)
    g_mean = g_sum / n
    g_var = g_sq / n - g_mean * g_mean                            # unbiased=False
    g_inv = lax.rsqrt(g_var + eps)                                # (B, G)

    mean_c = jnp.repeat(g_mean, cpg, axis=1)                      # (B, C)
    inv_c = jnp.repeat(g_inv, cpg, axis=1)                        # (B, C)
    w = jnp.ones((C,), jnp.float32) if weight is None else weight.astype(jnp.float32)
    bb = jnp.zeros((C,), jnp.float32) if bias is None else bias.astype(jnp.float32)
    scale = (inv_c * w[None, :]).reshape(B, C, 1)
    shift = (bb[None, :] - mean_c * inv_c * w[None, :]).reshape(B, C, 1)

    # ---- Pass 2: fused normalize + affine, lane-dense, both grid axes parallel.
    out = pl.pallas_call(
        _gn_apply_kernel,
        out_shape=jax.ShapeDtypeStruct((B, C, HW), jnp.float32),
        grid=(B, n_t),
        in_specs=[
            pl.BlockSpec((1, C, T), lambda b, t: (b, 0, t)),
            pl.BlockSpec((1, C, 1), lambda b, t: (b, 0, 0)),
            pl.BlockSpec((1, C, 1), lambda b, t: (b, 0, 0)),
        ],
        out_specs=pl.BlockSpec((1, C, T), lambda b, t: (b, 0, t)),
        compiler_params=pltpu.CompilerParams(
            dimension_semantics=("parallel", "parallel")),
    )(x, scale, shift)

    return out.reshape(B, C, H, W).astype(x_nchw.dtype)


# ----------------------------- reference & demo ----------------------------


def _group_norm_ref(x, weight, bias, num_groups, eps=1e-5):
    """Pure-JAX reference mirroring the PyTorch module's forward."""
    B, C, H, W = x.shape
    cpg = C // num_groups
    xg = x.reshape(B, num_groups, cpg, H, W)
    mean = xg.mean(axis=(2, 3, 4), keepdims=True)
    var = ((xg - mean) ** 2).mean(axis=(2, 3, 4), keepdims=True)
    y = ((xg - mean) / jnp.sqrt(var + eps)).reshape(B, C, H, W)
    return y * weight[None, :, None, None] + bias[None, :, None, None]


if __name__ == "__main__":
    B, C, H, W = 2, 4, 16, 16
    num_groups = 2

    key = jax.random.PRNGKey(0)
    k1, k2, k3 = jax.random.split(key, 3)
    x = jax.random.normal(k1, (B, C, H, W), jnp.float32) * 2.0 + 0.5
    weight = 1.0 + 0.2 * jax.random.normal(k2, (C,), jnp.float32)
    bias = 0.1 * jax.random.normal(k3, (C,), jnp.float32)

    ref = _group_norm_ref(x, weight, bias, num_groups, eps=1e-5)

    # Forced 128-wide spatial tiles -> 2 tiles per image, exercising the cross-tile
    # accumulator (init / accumulate) path.
    out_tiled = group_norm(x, weight, bias, num_groups, eps=1e-5, block_hw=128)
    out_tiled = jax.block_until_ready(out_tiled)
    assert out_tiled.shape == (B, C, H, W), out_tiled.shape
    assert jnp.all(jnp.isfinite(out_tiled))
    assert jnp.allclose(out_tiled, ref, atol=2e-4, rtol=2e-4), float(
        jnp.max(jnp.abs(out_tiled - ref)))

    # Auto tile selection (single tile at this small shape).
    out_auto = group_norm(x, weight, bias, num_groups, eps=1e-5)
    out_auto = jax.block_until_ready(out_auto)
    assert jnp.allclose(out_auto, ref, atol=2e-4, rtol=2e-4), float(
        jnp.max(jnp.abs(out_auto - ref)))

    print("KERNEL_OK")
</pallas_src>

<mosaic_0001>
module attributes {stable_mosaic.version = 11 : i64} {
  func.func @_gn_stats_kernel(%arg0: i32, %arg1: i32, %arg2: memref<1x4x128xf32, #tpu.memory_space<vmem>>, %arg3: memref<1x4x1xf32, #tpu.memory_space<vmem>>, %arg4: memref<1x4x1xf32, #tpu.memory_space<vmem>>) attributes {dimension_semantics = [#tpu.dimension_semantics<parallel>, #tpu.dimension_semantics<arbitrary>], iteration_bounds = array<i64: 2, 2>, scalar_prefetch = 0 : i64, scratch_operands = 0 : i64, tpu.core_type = #tpu.core_type<tc>, window_params = [{transform_indices = @transform_0, window_bounds = array<i64: 1, 4, 128>}, {transform_indices = @transform_1, window_bounds = array<i64: 1, 4, 1>}, {transform_indices = @transform_2, window_bounds = array<i64: 1, 4, 1>}]} {
    %c0_i32 = arith.constant 0 : i32
    %0 = arith.cmpi eq, %arg1, %c0_i32 : i32
    %1 = arith.extui %0 : i1 to i32
    %c0_i32_0 = arith.constant 0 : i32
    %2 = arith.cmpi ne, %1, %c0_i32_0 : i32
    scf.if %2 {
      %cst_16 = arith.constant 0.000000e+00 : f32
      %22 = vector.broadcast %cst_16 : f32 to vector<1x4x1xf32>
      %c0_17 = arith.constant 0 : index
      %c0_18 = arith.constant 0 : index
      %c0_19 = arith.constant 0 : index
      %23 = vector.load %arg3[%c0_17, %c0_18, %c0_19] : memref<1x4x1xf32, #tpu.memory_space<vmem>>, vector<1x4x1xf32>
      tpu.vector_store %arg3[%c0_17, %c0_18, %c0_19], %22 {strides = array<i32>} : memref<1x4x1xf32, #tpu.memory_space<vmem>>, vector<1x4x1xf32>,
      %cst_20 = arith.constant 0.000000e+00 : f32
      %24 = vector.broadcast %cst_20 : f32 to vector<1x4x1xf32>
      %c0_21 = arith.constant 0 : index
      %c0_22 = arith.constant 0 : index
      %c0_23 = arith.constant 0 : index
      %25 = vector.load %arg4[%c0_21, %c0_22, %c0_23] : memref<1x4x1xf32, #tpu.memory_space<vmem>>, vector<1x4x1xf32>
      tpu.vector_store %arg4[%c0_21, %c0_22, %c0_23], %24 {strides = array<i32>} : memref<1x4x1xf32, #tpu.memory_space<vmem>>, vector<1x4x1xf32>,
    } else {
    }
    %c0 = arith.constant 0 : index
    %c0_1 = arith.constant 0 : index
    %c0_2 = arith.constant 0 : index
    %3 = vector.load %arg2[%c0, %c0_1, %c0_2] : memref<1x4x128xf32, #tpu.memory_space<vmem>>, vector<1x4x128xf32>
    %4 = vector.shape_cast %3 : vector<1x4x128xf32> to vector<4x128xf32>
    %c0_3 = arith.constant 0 : index
    %c0_4 = arith.constant 0 : index
    %c0_5 = arith.constant 0 : index
    %5 = vector.load %arg3[%c0_3, %c0_4, %c0_5] : memref<1x4x1xf32, #tpu.memory_space<vmem>>, vector<1x4x1xf32>
    %6 = vector.shape_cast %5 : vector<1x4x1xf32> to vector<4x1xf32>
    %cst = arith.constant dense<0.000000e+00> : vector<4xf32>
    %7 = vector.multi_reduction <add>, %4, %cst [1] : vector<4x128xf32> to vector<4xf32>
    %8 = vector.shape_cast %7 : vector<4xf32> to vector<4x1xf32>
    %9 = arith.addf %6, %8 : vector<4x1xf32>
    %c0_6 = arith.constant 0 : index
    %c0_7 = arith.constant 0 : index
    %c0_8 = arith.constant 0 : index
    %10 = vector.load %arg3[%c0_6, %c0_7, %c0_8] : memref<1x4x1xf32, #tpu.memory_space<vmem>>, vector<1x4x1xf32>
    %11 = vector.shape_cast %10 : vector<1x4x1xf32> to vector<4x1xf32>
    %12 = vector.shape_cast %9 : vector<4x1xf32> to vector<1x4x1xf32>
    tpu.vector_store %arg3[%c0_6, %c0_7, %c0_8], %12 {strides = array<i32>} : memref<1x4x1xf32, #tpu.memory_space<vmem>>, vector<1x4x1xf32>,
    %c0_9 = arith.constant 0 : index
    %c0_10 = arith.constant 0 : index
    %c0_11 = arith.constant 0 : index
    %13 = vector.load %arg4[%c0_9, %c0_10, %c0_11] : memref<1x4x1xf32, #tpu.memory_space<vmem>>, vector<1x4x1xf32>
    %14 = vector.shape_cast %13 : vector<1x4x1xf32> to vector<4x1xf32>
    %15 = arith.mulf %4, %4 : vector<4x128xf32>
    %cst_12 = arith.constant dense<0.000000e+00> : vector<4xf32>
    %16 = vector.multi_reduction <add>, %15, %cst_12 [1] : vector<4x128xf32> to vector<4xf32>
    %17 = vector.shape_cast %16 : vector<4xf32> to vector<4x1xf32>
    %18 = arith.addf %14, %17 : vector<4x1xf32>
    %c0_13 = arith.constant 0 : index
    %c0_14 = arith.constant 0 : index
    %c0_15 = arith.constant 0 : index
    %19 = vector.load %arg4[%c0_13, %c0_14, %c0_15] : memref<1x4x1xf32, #tpu.memory_space<vmem>>, vector<1x4x1xf32>
    %20 = vector.shape_cast %19 : vector<1x4x1xf32> to vector<4x1xf32>
    %21 = vector.shape_cast %18 : vector<4x1xf32> to vector<1x4x1xf32>
    tpu.vector_store %arg4[%c0_13, %c0_14, %c0_15], %21 {strides = array<i32>} : memref<1x4x1xf32, #tpu.memory_space<vmem>>, vector<1x4x1xf32>,
    return
  }
  func.func @transform_0(%arg0: i32, %arg1: i32) -> (i32, i32, i32) {
    %c0_i32 = arith.constant 0 : i32
    %c0_i32_0 = arith.constant 0 : i32
    return %arg0, %c0_i32, %arg1 : i32, i32, i32
  }
  func.func @transform_1(%arg0: i32, %arg1: i32) -> (i32, i32, i32) {
    %c0_i32 = arith.constant 0 : i32
    %c0_i32_0 = arith.constant 0 : i32
    %c0_i32_1 = arith.constant 0 : i32
    return %arg0, %c0_i32, %c0_i32_0 : i32, i32, i32
  }
  func.func @transform_2(%arg0: i32, %arg1: i32) -> (i32, i32, i32) {
    %c0_i32 = arith.constant 0 : i32
    %c0_i32_0 = arith.constant 0 : i32
    %c0_i32_1 = arith.constant 0 : i32
    return %arg0, %c0_i32, %c0_i32_0 : i32, i32, i32
  }
}

</mosaic_0001>

<bundles_post_ra>
// kernel: tpu_custom_call.1
= control target key start
LH: loop header
LB: loop body
LE: loop exit
PB: predicated region body
PF: predicated region fallthrough
CT: control target
= control target key end

     0   :  { %8 = vsyncpa [#allocation3], 0  ;;  %s673_s0 = inlined_call_operand.hbm [shape: f32[2,4,256], index: 0, kind: input, shape index: {}]   ;;  %s674_s1 = inlined_call_operand.vmem [shape: f32[2,4,1], index: 1, kind: output, shape index: {0}]   ;;  %s675_s2 = inlined_call_operand.vmem [shape: f32[2,4,1], index: 2, kind: output, shape index: {1}]  }
   0x1   :  { %10 = vsyncpa [#allocation3 + $0x1], 0  ;;  %s519_s9 = smov 0   ;;  %s521_s10 = smov 0  }
   0x2   :  { %s523_s11 = smov 0   ;;  %s525_s12 = smov 0  }
   0x3   :  { %s527_s13 = smov 0   ;;  %s529_s14 = smov 0  }
   0x4   :  { %s531_s15 = smov 0   ;;  %s533_s16 = smov 0  }
   0x5 LB: > { %s318_s17 = sadd.s32 4294967295, %s500_s16   ;;  %s25_s18 = sadd.s32 1, %s492_s14  ;;  %s500_s16 = sphi %s533_s16, %s16_s16   ;;  %s496_s15 = sphi %s531_s15, %s687_s15   ;;  %s492_s14 = sphi %s529_s14, %s686_s14   ;;  %s488_s13 = sphi %s527_s13, %s685_s13   ;;  %s484_s12 = sphi %s525_s12, %s684_s12   ;;  %s480_s11 = sphi %s523_s11, %s683_s11   ;;  %s476_s10 = sphi %s521_s10, %s682_s10   ;;  %s472_s9 = sphi %s519_s9, %s681_s9  }
   0x6   : > { %p26_p0 = scmp.ge.s32.totalorder %s25_s18, 2  ;;  %s28_s19 = sadd.s32 1, %s496_s15 }
   0x7   : > { %s37_s20 = sadd.s32 1, %s480_s11  ;;  %p44_p1 = scmp.ne.s32.totalorder %s480_s11, %s476_s10 }
   0x8   : > { %s689_s18 = smov (%p26_p0, %s25_s18), 0  ;;  %s691_s19 = smov (!%p26_p0, %s28_s19), %s496_s15 }
   0x9   : > { %s33_s21 = ssub.s32 %s492_s14, %s689_s18  ;;  %p45_p2 = scmp.eq.s32.totalorder %s500_s16, 0 }
   0xa   : > { %p30_p3 = scmp.ge.s32.totalorder %s691_s19, 2  ;;  %p50_p4 = scmp.ne.s32.totalorder %s476_s10, %s472_s9 }
   0xb   : > { %p570_p5 = por %p45_p2, %p44_p1  ;;  %p51_p6 = scmp.eq.s32.totalorder %s318_s17, 0 }
   0xc   : > { %s693_s19 = smov (%p30_p3, %s691_s19), 0  ;;  %p338_p8 = scmp.lt.s32.totalorder %s500_s16, 4 }
   0xd   : > { %p576_p7 = por %p51_p6, %p50_p4  ;;  %s32_s24 = ssub.s32 %s496_s15, %s693_s19 }
   0xe   : > { %s34_s25 = sor.u32 %s33_s21, %s32_s24  ;;  %s126_s26 = sand.u32 1, %s480_s11  }
   0xf   : > { %p35_p9 = scmp.eq.s32.totalorder %s34_s25, 0  ;;  %s322_s27 = sshll.u32 %s126_s26, 2 }
  0x10   : > { %s323_s28 = sshll.u32 %s496_s15, 1  ;;  %s130_s4 = scalar_lea.vmem [#allocation2], %s322_s27 }
  0x11   : > { %s586_s29 = scalar_select %p35_p9, %s480_s11, %s37_s20  }
  0x12   : > { %s135_s30 = sadd.s32 %s492_s14, %s323_s28  ;;  %s139_s5 = sshll.u32 %s130_s4, 4  ;;  %s594_s5 = int_to_ptr.vmem [resolvable:$true] %s139_s5 }
  0x13   : > { %s324_s3 = sshll.u32 %s135_s30, 6  ;;  %p600_p10 = pnand %p338_p8, %p570_p5 }
  0x14   : > { %s592_s8 = scalar_lea.hbm %s673_s0, %s324_s3  ;;  %s127_s17 = scalar_lea.sflag [#allocation3], %s126_s26 }
  0x15   : > { %s404_s20 = scalar_lea.hbm %s592_s8, 64  ;;  %p406_p0 = pneg %p600_p10 }
  0x16   : > { %p405_p13 = scmp.ne.s32.totalorder %s592_s8, %s404_s20  ;;  %s409_s24 = scalar_lea.hbm %s673_s0, 256 }
  0x17   : > { %p410_p3 = scmp.lt.u32.totalorder %s592_s8, %s673_s0  ;;  %p411_p4 = scmp.lt.u32.totalorder %s409_s24, %s404_s20 }
  0x18   : > { %p407_p1 = pnand %p406_p0, %p405_p13  ;;  %p413_p6 = scmp.lt.u32.totalorder %s404_s20, %s592_s8 }
  0x19   : > { %p412_p5 = por %p411_p4, %p410_p3 }
  0x1a   : > { %p408_p2 = pneg %p407_p1 }
  0x1b   : > { %p414_p8 = por %p413_p6, %p412_p5 }
  0x1d   : > { %p415_p9 = pnand %p414_p8, %p408_p2 }
  0x1f   : > { %418 = shalt.err (!%p415_p9)
}
  0x20   : > { %s419_s26 = scalar_lea.vmem %s594_s5, 64  ;;  %s502_s28 = smov [#allocation2]  }
  0x21   : > { %p420_p13 = scmp.ne.s32.totalorder %s594_s5, %s419_s26  ;;  %s424_s30 = sshll.u32 %s502_s28, 4  ;;  %s425_s30 = int_to_ptr.vmem [resolvable:$false] %s424_s30 }
  0x22   : > { %s426_s3 = scalar_lea.vmem %s425_s30, 128  ;;  %p427_p12 = scmp.lt.s32.totalorder %s594_s5, %s425_s30 }
  0x23   : > { %p422_p1 = pnand %p420_p13, %p406_p0  ;;  %p428_p3 = scmp.lt.s32.totalorder %s426_s3, %s419_s26 }
  0x25   : > { %p423_p11 = pneg %p422_p1  ;;  %p429_p4 = por %p428_p3, %p427_p12 }
  0x27   : > { %p430_p5 = pnand %p429_p4, %p423_p11 }
  0x29   : > { %433 = shalt.err (!%p430_p5)
}
  0x2a   : > { %337 = dma.hbm_to_vmem [thread:$0]  (!%p600_p10), %s592_s8, 64, %s594_s5, %s127_s17  }
  0x2b   : > { %p679_p2 = scmp.lt.s32.totalorder %s500_s16, 5  ;;  %p680_p6 = scmp.ge.s32.totalorder %s500_s16, 1 }
  0x2d   : > { %p145_p0 = pnand %p680_p6, %p679_p2 }
  0x2e   : > { %s150_s4 = sand.u32 (!%p145_p0), 1, %s476_s10  }
  0x2f   : > { %148 = sbr.rel (%p145_p0) target bundleno = 215 (0xd7), region = 24  ;;  %s326_s6 = sshll.u32 (!%p145_p0), %s150_s4, 2 }
  0x30   : > { %s151_s7 = scalar_lea.sflag (!%p145_p0), [#allocation3], %s150_s4  ;;  %s154_s20 = scalar_lea.vmem (!%p145_p0), [#allocation2], %s326_s6 }
  0x36   : > { %467 = dma.done.wait (%p576_p7), %s151_s7, 64  }
  0x37   : > { %469 = vsyncadd (%p576_p7), %s151_s7, 4294967232  ;;  %p178_p11 = scmp.lt.s32.totalorder %s488_s13, 1  ;;  %p329_p10 = scmp.ne.s32.totalorder %s484_s12, 0 }
  0x38   : > { %vm190_vm0 = vcmask (!%p329_p10), 3072   ;;  %v503_v0 = vmov (!%p329_p10), 0.0  }
  0x39   : > { %s695_s13 = smov (!%p178_p11, %s488_s13), 1  ;;  %189 = sbr.rel (%p329_p10) target bundleno = 64 (0x40), region = 32 }
  0x3a   : > { %s327_s5 = sshll.u32 %s695_s13, 2 }
  0x3b   : > { %s181_s17 = scalar_lea.vmem %s674_s1, %s327_s5  ;;  %s185_s24 = scalar_lea.vmem %s675_s2, %s327_s5 }
  0x3c   : > { %191 = vst.msk [vmem:[%s181_s17] sm:$0xf] (!%p329_p10), %vm190_vm0, %v503_v0  ;;  %192 = vst.msk [vmem:[%s185_s24] sm:$0xf] (!%p329_p10), %vm190_vm0, %v503_v0 }
  0x40 PF: > { %v193_v1 = vld [vmem:[%s154_s20] sm:$0xf]  ;;  %vm195_vm1 = vcmask 1043456   ;;  %vm200_vm2 = vcmask 3072  }
  0x41   : > { %v196_v2 = vsel %vm195_vm1, %v193_v1, 0.0  ;;  %v203_v3 = vmul.f32 %v193_v1, %v193_v1 }
  0x42   : > { %197 = vadd.xlane.f32.xlu0 %v196_v2 }
  0x43   : > { %v204_v4 = vsel %vm195_vm1, %v203_v3, 0.0  ;;  %v194_v5 = vld [vmem:[%s181_s17] sm:$0xf] }
  0x44   : > { %v202_v8 = vld [vmem:[%s185_s24] sm:$0xf] }
  0x46   : > { %205 = vadd.xlane.f32.xlu0 %v204_v4 }
  0xcf   : > { %v198_v6 = vpop.xlane.xlu0 %197 }
  0xd0   : > { %v199_v7 = vadd.f32 %v198_v6, %v194_v5 }
  0xd2   : > { %201 = vst.msk [vmem:[%s181_s17] sm:$0xf] %vm200_vm2, %v199_v7 }
  0xd3   : > { %v206_v9 = vpop.xlane.xlu0 %205 }
  0xd4   : > { %v207_v10 = vadd.f32 %v206_v9, %v202_v8 }
  0xd6   : > { %208 = vst.msk [vmem:[%s185_s24] sm:$0xf] %vm200_vm2, %v207_v10 }
  0xd7 PF: > { %s16_s16 = sadd.s32 1, %s500_s16   ;;  %s681_s9 = smov %s476_s10 }
  0xd8   : > { %p13_p7 = scmp.ge.s32.totalorder %s16_s16, 6   ;;  %s682_s10 = smov %s480_s11 }
  0xd9   : > { %s683_s11 = smov %s586_s29  ;;  %s684_s12 = smov %s492_s14 }
  0xda   : > { %s685_s13 = smov %s496_s15  ;;  %s686_s14 = smov %s689_s18 }
  0xdb   : > { %s687_s15 = smov %s693_s19  ;;  %15 = sbr.rel (!%p13_p7) target bundleno = 5 (0x5), region = 80 }
  0xe2   :  { %242 = vsyncpa [#allocation3], 1 }
  0xe3   :  { %244 = vsyncpa [#allocation3 + $0x1], 1 }

</bundles_post_ra>
